<compile_context>
chip_gen: v7x
topology: tpu7x:2x2x1
jax: 0.10.0
libtpu: 0.0.40
codegen_flags: <defaults>
</compile_context>

<pallas_src>
import jax
import jax.numpy as jnp
from jax.experimental import pallas as pl
from jax.experimental.pallas import tpu as pltpu

N_IN, N_HID, N_OUT = 784, 256, 10
N_OUT_PAD = 128   # lane-dense output width (pad 10 -> 128; sliced outside)
TB_MAX = 1024     # max batch tile rows: amortizes grid-step overhead, v5e VMEM-safe


def mlp_kernel(x_ref, w1_ref, b1_ref, w2_ref, b2_ref, out_ref):
    # In-kernel f32 -> bf16 cast of the activations (VPU work hidden under the
    # MXU): x is read from HBM exactly once, as f32, with no wrapper cast pass.
    x = x_ref[...].astype(jnp.bfloat16)
    # Layer 1: (TB, 784)bf16 @ (784, 256)bf16 -> f32 accumulate on the MXU.
    h = jnp.dot(x, w1_ref[...], preferred_element_type=jnp.float32)
    h = jnp.maximum(h + b1_ref[...], 0.0)          # bias + ReLU in f32 (VPU)
    # Layer 2: (TB, 256)bf16 @ (256, 128)bf16 -> f32.  N padded 10 -> 128 so
    # the store below is a full-lane vst, written back as bf16 (half the bytes).
    o = jnp.dot(h.astype(jnp.bfloat16), w2_ref[...],
                preferred_element_type=jnp.float32)
    out_ref[...] = (o + b2_ref[...]).astype(out_ref.dtype)


def _round_up(n, m):
    return ((n + m - 1) // m) * m


def _pick_batch_tile(b):
    """Batch tile (rows): one tile below 512 rows; at/above 512 rows split into
    >= 2 roughly equal tiles so both v7x TensorCores get a 'parallel' grid
    step; capped at TB_MAX.  Always a multiple of 8 (sublane) and never larger
    than the (>= 8-row) batch, so blocks never exceed the array extent."""
    if b < 512:
        return max(8, (b // 8) * 8)
    return min(TB_MAX, _round_up(pl.cdiv(b, 2), 8))


def prepare_params(w1, b1, w2, b2):
    """One-time weight prep (do NOT call per forward): bf16 weights, (1, N)
    f32 bias rows, and layer-2 N zero-padded 10 -> 128 for a lane-dense store.
    The zero columns never leak: the wrapper slices [:, :10]."""
    w1_bf = w1.astype(jnp.bfloat16)
    b1_2d = b1.reshape(1, N_HID).astype(jnp.float32)
    w2_p = jnp.zeros((N_HID, N_OUT_PAD), jnp.bfloat16).at[:, :N_OUT].set(
        w2.astype(jnp.bfloat16))
    b2_p = jnp.zeros((1, N_OUT_PAD), jnp.float32).at[0, :N_OUT].set(
        b2.astype(jnp.float32))
    return w1_bf, b1_2d, w2_p, b2_p


def simple_nn_forward(x, params):
    """x: (B, 784) f32; params: output of prepare_params().

    Returns (B, 10) f32 logits = relu(x @ w1 + b1) @ w2 + b2.
    """
    w1_bf, b1_2d, w2_p, b2_p = params
    B = x.shape[0]
    if B < 8:
        # Sublane minimum: pad tiny batches up to 8 rows (negligible bytes).
        x = jnp.pad(x, ((0, 8 - B), (0, 0)))
    bp = x.shape[0]
    tb = _pick_batch_tile(bp)
    grid = (pl.cdiv(bp, tb),)

    # When tb does not divide bp, the last batch tile is ragged: its
    # out-of-bounds x rows are undefined on read and its out-of-bounds output
    # rows are masked on write.  This is safe ONLY because rows never mix
    # (row-wise matmuls, no reduction over the batch axis) -- keep that
    # invariant if this kernel is ever changed.
    #
    # TODO(synk): repeated tiny-batch inference is pure weight-DMA + launch
    # overhead; pin weights in VMEM across calls (cross-call prefetch, P10).
    # TODO(synk): single-buffer the resident weight/bias specs with
    # pipeline_mode=pl.Buffered(1) once verified on the target jax version
    # (reclaims ~0.5 MiB of redundant double-buffer VMEM).
    out = pl.pallas_call(
        mlp_kernel,
        out_shape=jax.ShapeDtypeStruct((bp, N_OUT_PAD), jnp.bfloat16),
        grid_spec=pltpu.PrefetchScalarGridSpec(
            num_scalar_prefetch=0,
            grid=grid,
            in_specs=[
                # x: tiled over batch -> double-buffered, overlaps with compute.
                pl.BlockSpec((tb, N_IN), lambda i: (i, 0)),
                # Weights/biases: constant block index -> staged once, resident.
                pl.BlockSpec((N_IN, N_HID), lambda i: (0, 0)),
                pl.BlockSpec((1, N_HID), lambda i: (0, 0)),
                pl.BlockSpec((N_HID, N_OUT_PAD), lambda i: (0, 0)),
                pl.BlockSpec((1, N_OUT_PAD), lambda i: (0, 0)),
            ],
            out_specs=pl.BlockSpec((tb, N_OUT_PAD), lambda i: (i, 0)),
        ),
        compiler_params=pltpu.CompilerParams(
            # Batch tiles are independent -> shard across TCs on v7x megacore.
            dimension_semantics=("parallel",),
        ),
    )(x, w1_bf, b1_2d, w2_p, b2_p)

    # Tiny (B, 10) slice + cast back to f32; fuses with the consumer under jit.
    return out[:B, :N_OUT].astype(jnp.float32)


def init_params(key):
    """Deterministic init mimicking nn.Linear's uniform(-1/sqrt(fan_in), ...)."""
    k1, k2, k3, k4 = jax.random.split(key, 4)
    bound1 = 1.0 / jnp.sqrt(784.0)
    bound2 = 1.0 / jnp.sqrt(256.0)
    # Stored as (in, out) so the kernel does x @ W (equivalent to x @ W_pt.T).
    w1 = jax.random.uniform(k1, (784, 256), jnp.float32, -bound1, bound1)
    b1 = jax.random.uniform(k2, (256,), jnp.float32, -bound1, bound1)
    w2 = jax.random.uniform(k3, (256, 10), jnp.float32, -bound2, bound2)
    b2 = jax.random.uniform(k4, (10,), jnp.float32, -bound2, bound2)
    return w1, b1, w2, b2


if __name__ == "__main__":
    key = jax.random.PRNGKey(0)
    kx, kp = jax.random.split(key)
    w1, b1, w2, b2 = init_params(kp)
    params = prepare_params(w1, b1, w2, b2)   # one-time weight prep

    def ref_fwd(x):
        return jnp.maximum(x @ w1 + b1, 0.0) @ w2 + b2

    fwd = jax.jit(simple_nn_forward)

    # Small demo batch (MNIST-style 784-dim rows).
    B = 8
    x = jax.random.normal(kx, (B, N_IN), jnp.float32)
    out = jax.block_until_ready(fwd(x, params))
    ref = ref_fwd(x)
    assert out.shape == (B, N_OUT)
    # bf16 matmuls + bf16 output with f32 accumulation -> loosened tolerance.
    assert jnp.allclose(out, ref, atol=5e-2, rtol=5e-2), float(
        jnp.max(jnp.abs(out - ref)))

    # Non-tile-aligned larger batch: exercises ragged-tile masking and the
    # >=2-parallel-tile split (tb=264, grid=(2,)) with resident weights.
    B2 = 520
    x2 = jax.random.normal(jax.random.PRNGKey(1), (B2, N_IN), jnp.float32)
    out2 = jax.block_until_ready(fwd(x2, params))
    ref2 = ref_fwd(x2)
    assert out2.shape == (B2, N_OUT)
    assert jnp.allclose(out2, ref2, atol=5e-2, rtol=5e-2), float(
        jnp.max(jnp.abs(out2 - ref2)))

    print("KERNEL_OK")
</pallas_src>

<mosaic_0001>
module attributes {stable_mosaic.version = 11 : i64} {
  func.func @mlp_kernel(%arg0: i32, %arg1: memref<8x784xf32, #tpu.memory_space<vmem>>, %arg2: memref<784x256xbf16, #tpu.memory_space<vmem>>, %arg3: memref<1x256xf32, #tpu.memory_space<vmem>>, %arg4: memref<256x128xbf16, #tpu.memory_space<vmem>>, %arg5: memref<1x128xf32, #tpu.memory_space<vmem>>, %arg6: memref<8x128xbf16, #tpu.memory_space<vmem>>) attributes {dimension_semantics = [#tpu.dimension_semantics<parallel>], iteration_bounds = array<i64: 1>, scalar_prefetch = 0 : i64, scratch_operands = 0 : i64, tpu.core_type = #tpu.core_type<tc>, window_params = [{transform_indices = @transform_0, window_bounds = array<i64: 8, 784>}, {pipeline_mode = #tpu.pipeline_mode<synchronous>, transform_indices = @transform_1, window_bounds = array<i64: 784, 256>}, {pipeline_mode = #tpu.pipeline_mode<synchronous>, transform_indices = @transform_2, window_bounds = array<i64: 1, 256>}, {pipeline_mode = #tpu.pipeline_mode<synchronous>, transform_indices = @transform_3, window_bounds = array<i64: 256, 128>}, {pipeline_mode = #tpu.pipeline_mode<synchronous>, transform_indices = @transform_4, window_bounds = array<i64: 1, 128>}, {transform_indices = @transform_5, window_bounds = array<i64: 8, 128>}]} {
    %c0 = arith.constant 0 : index
    %c0_0 = arith.constant 0 : index
    %0 = vector.load %arg1[%c0, %c0_0] : memref<8x784xf32, #tpu.memory_space<vmem>>, vector<8x784xf32>
    %1 = arith.truncf %0 : vector<8x784xf32> to vector<8x784xbf16>
    %c0_1 = arith.constant 0 : index
    %c0_2 = arith.constant 0 : index
    %2 = vector.load %arg2[%c0_1, %c0_2] : memref<784x256xbf16, #tpu.memory_space<vmem>>, vector<784x256xbf16>
    %cst = arith.constant dense<0.000000e+00> : vector<8x256xf32>
    %3 = tpu.matmul %1, %2, %cst {dimension_numbers = #tpu.dot_dimension_numbers<[1], [0], [0], [1], [0, 0, 1, 1], [], []>} : vector<8x784xbf16>, vector<784x256xbf16>, vector<8x256xf32> -> vector<8x256xf32>
    %c0_3 = arith.constant 0 : index
    %c0_4 = arith.constant 0 : index
    %4 = vector.load %arg3[%c0_3, %c0_4] : memref<1x256xf32, #tpu.memory_space<vmem>>, vector<1x256xf32>
    %5 = vector.broadcast %4 : vector<1x256xf32> to vector<8x256xf32>
    %6 = arith.addf %3, %5 : vector<8x256xf32>
    %cst_5 = arith.constant 0.000000e+00 : f32
    %7 = vector.broadcast %cst_5 : f32 to vector<8x256xf32>
    %8 = arith.maximumf %6, %7 : vector<8x256xf32>
    %9 = arith.truncf %8 : vector<8x256xf32> to vector<8x256xbf16>
    %c0_6 = arith.constant 0 : index
    %c0_7 = arith.constant 0 : index
    %10 = vector.load %arg4[%c0_6, %c0_7] : memref<256x128xbf16, #tpu.memory_space<vmem>>, vector<256x128xbf16>
    %cst_8 = arith.constant dense<0.000000e+00> : vector<8x128xf32>
    %11 = tpu.matmul %9, %10, %cst_8 {dimension_numbers = #tpu.dot_dimension_numbers<[1], [0], [0], [1], [0, 0, 1, 1], [], []>} : vector<8x256xbf16>, vector<256x128xbf16>, vector<8x128xf32> -> vector<8x128xf32>
    %c0_9 = arith.constant 0 : index
    %c0_10 = arith.constant 0 : index
    %12 = vector.load %arg5[%c0_9, %c0_10] : memref<1x128xf32, #tpu.memory_space<vmem>>, vector<1x128xf32>
    %13 = vector.broadcast %12 : vector<1x128xf32> to vector<8x128xf32>
    %14 = arith.addf %11, %13 : vector<8x128xf32>
    %15 = arith.truncf %14 : vector<8x128xf32> to vector<8x128xbf16>
    %c0_11 = arith.constant 0 : index
    %c0_12 = arith.constant 0 : index
    %16 = vector.load %arg6[%c0_11, %c0_12] : memref<8x128xbf16, #tpu.memory_space<vmem>>, vector<8x128xbf16>
    tpu.vector_store %arg6[%c0_11, %c0_12], %15 {strides = array<i32>} : memref<8x128xbf16, #tpu.memory_space<vmem>>, vector<8x128xbf16>,
    return
  }
  func.func @transform_0(%arg0: i32) -> (i32, i32) {
    %c0_i32 = arith.constant 0 : i32
    %c0_i32_0 = arith.constant 0 : i32
    return %arg0, %c0_i32 : i32, i32
  }
  func.func @transform_1(%arg0: i32) -> (i32, i32) {
    %c0_i32 = arith.constant 0 : i32
    %c0_i32_0 = arith.constant 0 : i32
    %c0_i32_1 = arith.constant 0 : i32
    return %c0_i32, %c0_i32_0 : i32, i32
  }
  func.func @transform_2(%arg0: i32) -> (i32, i32) {
    %c0_i32 = arith.constant 0 : i32
    %c0_i32_0 = arith.constant 0 : i32
    %c0_i32_1 = arith.constant 0 : i32
    return %c0_i32, %c0_i32_0 : i32, i32
  }
  func.func @transform_3(%arg0: i32) -> (i32, i32) {
    %c0_i32 = arith.constant 0 : i32
    %c0_i32_0 = arith.constant 0 : i32
    %c0_i32_1 = arith.constant 0 : i32
    return %c0_i32, %c0_i32_0 : i32, i32
  }
  func.func @transform_4(%arg0: i32) -> (i32, i32) {
    %c0_i32 = arith.constant 0 : i32
    %c0_i32_0 = arith.constant 0 : i32
    %c0_i32_1 = arith.constant 0 : i32
    return %c0_i32, %c0_i32_0 : i32, i32
  }
  func.func @transform_5(%arg0: i32) -> (i32, i32) {
    %c0_i32 = arith.constant 0 : i32
    %c0_i32_0 = arith.constant 0 : i32
    return %arg0, %c0_i32 : i32, i32
  }
}

</mosaic_0001>

<bundles_post_ra>
// kernel: simple_nn_forward.1
= control target key start
LH: loop header
LB: loop body
LE: loop exit
PB: predicated region body
PF: predicated region fallthrough
CT: control target
= control target key end

     0   :  { %10 = vsyncpa [#allocation3], 0  ;;  %s1501_s0 = inlined_call_operand.hbm [shape: f32[8,784], index: 0, kind: input, shape index: {}]   ;;  %s1502_s1 = inlined_call_operand.hbm [shape: bf16[784,256], index: 1, kind: input, shape index: {}]   ;;  %s1503_s2 = inlined_call_operand.vmem [shape: f32[1,256], index: 2, kind: input, shape index: {}]   ;;  %s1504_s3 = inlined_call_operand.hbm [shape: bf16[256,128], index: 3, kind: input, shape index: {}]   ;;  %s1505_s4 = inlined_call_operand.vmem [shape: f32[1,128], index: 4, kind: input, shape index: {}]   ;;  %s1506_s5 = inlined_call_operand.vmem [shape: bf16[8,128], index: 5, kind: output, shape index: {}]  }
   0x1   :  { %11 = vsyncpa [#allocation5], 0  ;;  %s1418_s18 = smov [#allocation4]   ;;  %s1348_s22 = scalar_lea.hbm %s1502_s1, 12544 }
   0x2   :  { %s27_s19 = sshll.u32 %s1418_s18, 4  ;;  %p1349_p0 = scmp.ne.s32.totalorder %s1502_s1, %s1348_s22  ;;  %s28_s19 = int_to_ptr.vmem [resolvable:$true] %s27_s19 }
   0x3   :  { %p1352_p1 = scmp.lt.u32.totalorder %s1348_s22, %s1502_s1 }
   0x5   :  { %p1354_p2 = pnand %p1352_p1, %p1349_p0 }
   0x7   :  { %1357 = shalt.err (!%p1354_p2)
}
   0x8   :  { %s1358_s27 = scalar_lea.vmem %s28_s19, 12544  ;;  %p1363_p4 = scmp.lt.s32.totalorder %s28_s19, %s28_s19 }
   0x9   :  { %p1359_p3 = scmp.ne.s32.totalorder %s28_s19, %s1358_s27  ;;  %p1364_p5 = scmp.lt.s32.totalorder %s1358_s27, %s1358_s27 }
   0xb   :  { %p1365_p6 = por %p1364_p5, %p1363_p4 }
   0xd   :  { %p1366_p7 = pnand %p1365_p6, %p1359_p3 }
   0xf   :  { %1369 = shalt.err (!%p1366_p7)
}
  0x10   :  { %s1419_s28 = smov 128   ;;  %s1420_s29 = smov 8  }
  0x11   :  { %33 = dma.hbm_to_vmem [thread:$0]  %s1502_s1, 12544, %s28_s19, [#allocation5], %s1419_s28, %s1419_s28, %s1420_s29  }
  0x12   :  { %s1421_s7 = smov [#allocation2]   ;;  %s1422_s9 = smov [#allocation6]  }
  0x13   :  { %s18_s8 = sshll.u32 %s1421_s7, 4  ;;  %s41_s10 = sshll.u32 %s1422_s9, 4  ;;  %s19_s8 = int_to_ptr.vmem [resolvable:$true] %s18_s8  ;;  %s42_s10 = int_to_ptr.vmem [resolvable:$true] %s41_s10 }
  0x14   :  { %s1370_s13 = scalar_lea.hbm %s1501_s0, 896 }
  0x15   :  { %p1371_p8 = scmp.ne.s32.totalorder %s1501_s0, %s1370_s13  ;;  %p1374_p9 = scmp.lt.u32.totalorder %s1370_s13, %s1501_s0 }
  0x17   :  { %p1376_p10 = pnand %p1374_p9, %p1371_p8 }
  0x19   :  { %1379 = shalt.err (!%p1376_p10)
}
  0x1a   :  { %s1380_s1 = scalar_lea.vmem %s19_s8, 896  ;;  %p1385_p12 = scmp.lt.s32.totalorder %s19_s8, %s19_s8 }
  0x1b   :  { %p1381_p11 = scmp.ne.s32.totalorder %s19_s8, %s1380_s1  ;;  %p1386_p13 = scmp.lt.s32.totalorder %s1380_s1, %s1380_s1 }
  0x1d   :  { %p1387_p0 = por %p1386_p13, %p1385_p12 }
  0x1f   :  { %p1388_p1 = pnand %p1387_p0, %p1381_p11 }
  0x21   :  { %1391 = shalt.err (!%p1388_p1)
}
  0x22   :  { %21 = dma.hbm_to_vmem [thread:$0]  %s1501_s0, 896, %s19_s8, [#allocation3]  }
  0x23   :  { %s1392_s22 = scalar_lea.hbm %s1504_s3, 2048 }
  0x24   :  { %p1393_p2 = scmp.ne.s32.totalorder %s1504_s3, %s1392_s22  ;;  %p1396_p3 = scmp.lt.u32.totalorder %s1392_s22, %s1504_s3 }
  0x26   :  { %p1398_p4 = pnand %p1396_p3, %p1393_p2 }
  0x28   :  { %1401 = shalt.err (!%p1398_p4)
}
  0x29   :  { %s1402_s27 = scalar_lea.vmem %s42_s10, 2048  ;;  %p1407_p6 = scmp.lt.s32.totalorder %s42_s10, %s42_s10 }
  0x2a   :  { %p1403_p5 = scmp.ne.s32.totalorder %s42_s10, %s1402_s27  ;;  %p1408_p7 = scmp.lt.s32.totalorder %s1402_s27, %s1402_s27 }
  0x2c   :  { %p1409_p8 = por %p1408_p7, %p1407_p6 }
  0x2e   :  { %p1410_p9 = pnand %p1409_p8, %p1403_p5 }
  0x30   :  { %1413 = shalt.err (!%p1410_p9)
}
  0x31   :  { %s1423_s0 = smov 64   ;;  %s1424_s28 = smov 4  }
  0x32   :  { %47 = dma.hbm_to_vmem [thread:$0]  %s1504_s3, 2048, %s42_s10, [#allocation5], %s1423_s0, %s1423_s0, %s1424_s28  }
  0x33   :  { %1414 = dma.done.wait [#allocation3], 896  }
  0x34   :  { %1415 = vsyncadd [#allocation3], 4294966400 }
  0x35   :  { %1416 = dma.done.wait [#allocation5], 14592  }
  0x36   :  { %1417 = vsyncadd [#allocation5], 4294952704  ;;  %v1185_v0 = vld [vmem:[#allocation4 + $0x104] ss:$8 sps:$4 sm:$0xff]   ;;  %v1187_v1 = vld [vmem:[#allocation4 + $0x100] ss:$8 sps:$4 sm:$0xff]  }
  0x37   :  { %719 = vmatprep.subr.bf16.mxu0 %v1185_v0  ;;  %v1188_v2 = vld [vmem:[#allocation4 + $0x114] ss:$8 sps:$4 sm:$0xff]   ;;  %v1190_v3 = vld [vmem:[#allocation4 + $0x110] ss:$8 sps:$4 sm:$0xff]   ;;  %v1191_v4 = vld [vmem:[#allocation4 + $0x124] ss:$8 sps:$4 sm:$0xff]  }
  0x38   :  { %720 = vmatpush1.bf16.msra.mxu0 %v1187_v1  ;;  %v1193_v5 = vld [vmem:[#allocation4 + $0x120] ss:$8 sps:$4 sm:$0xff]   ;;  %v1194_v6 = vld [vmem:[#allocation4 + $0x134] ss:$8 sps:$4 sm:$0xff]   ;;  %v1196_v7 = vld [vmem:[#allocation4 + $0x130] ss:$8 sps:$4 sm:$0xff]  }
  0x39   :  { %721 = vmatprep.subr.bf16.mxu0 %v1188_v2  ;;  %v1197_v8 = vld [vmem:[#allocation4 + $0x144] ss:$8 sps:$4 sm:$0xff]   ;;  %v1199_v9 = vld [vmem:[#allocation4 + $0x140] ss:$8 sps:$4 sm:$0xff]   ;;  %v1200_v10 = vld [vmem:[#allocation4 + $0x154] ss:$8 sps:$4 sm:$0xff]  }
  0x3a   :  { %v1202_v11 = vld [vmem:[#allocation4 + $0x150] ss:$8 sps:$4 sm:$0xff]   ;;  %v1227_v12 = vld [vmem:[#allocation4 + $0x4] ss:$8 sps:$4 sm:$0xff]   ;;  %v1229_v13 = vld [vmem:[#allocation4] ss:$8 sps:$4 sm:$0xff]  }
  0x3b   :  { %v1203_v14 = vld [vmem:[#allocation4 + $0x164] ss:$8 sps:$4 sm:$0xff]   ;;  %678 = vmatprep.subr.bf16.mxu1 %v1227_v12  ;;  %v1233_v15 = vld [vmem:[#allocation4 + $0x14] ss:$8 sps:$4 sm:$0xff]   ;;  %v1235_v16 = vld [vmem:[#allocation4 + $0x10] ss:$8 sps:$4 sm:$0xff]  }
  0x3c   :  { %722 = vmatpush1.bf16.msra.mxu0 %v1190_v3  ;;  %679 = vmatpush1.bf16.msra.mxu1 %v1229_v13  ;;  %v1205_v17 = vld [vmem:[#allocation4 + $0x160] ss:$8 sps:$4 sm:$0xff]   ;;  %v1206_v18 = vld [vmem:[#allocation4 + $0x174] ss:$8 sps:$4 sm:$0xff]   ;;  %v1239_v19 = vld [vmem:[#allocation4 + $0x24] ss:$8 sps:$4 sm:$0xff]  }
  0x3d   :  { %723 = vmatprep.subr.bf16.mxu0 %v1191_v4  ;;  %680 = vmatprep.subr.bf16.mxu1 %v1233_v15  ;;  %v63_v20 = vld [vmem:[#allocation2 + $0x18] sm:$0xff]  ;;  %v1208_v23 = vld [vmem:[#allocation4 + $0x170] ss:$8 sps:$4 sm:$0xff]   ;;  %v1245_v25 = vld [vmem:[#allocation4 + $0x34] ss:$8 sps:$4 sm:$0xff]   ;;  %vm674_vm0 = vcmask 130048  }
  0x3e   :  { %v1241_v21 = vld [vmem:[#allocation4 + $0x20] ss:$8 sps:$4 sm:$0xff]   ;;  %v70_v22 = vpack.c.bf16 %v63_v20, %v63_v20  ;;  %v1209_v24 = vld [vmem:[#allocation4 + $0x184] ss:$8 sps:$4 sm:$0xff]   ;;  %v1247_v27 = vld [vmem:[#allocation4 + $0x30] ss:$8 sps:$4 sm:$0xff]  }
  0x3f   :  { %v1211_v26 = vld [vmem:[#allocation4 + $0x180] ss:$8 sps:$4 sm:$0xff]   ;;  %v1251_v28 = vld [vmem:[#allocation4 + $0x44] ss:$8 sps:$4 sm:$0xff]   ;;  %v1212_v29 = vld [vmem:[#allocation4 + $0x194] ss:$8 sps:$4 sm:$0xff]  }
  0x40   :  { %724 = vmatpush1.bf16.msra.mxu0 %v1193_v5  ;;  %681 = vmatpush1.bf16.msra.mxu1 %v1235_v16  ;;  %v1214_v30 = vld [vmem:[#allocation4 + $0x190] ss:$8 sps:$4 sm:$0xff]   ;;  %v1253_v31 = vld [vmem:[#allocation4 + $0x40] ss:$8 sps:$4 sm:$0xff]   ;;  %v1257_v32 = vld [vmem:[#allocation4 + $0x54] ss:$8 sps:$4 sm:$0xff]  }
  0x41   :  { %725 = vmatprep.subr.bf16.mxu0 %v1194_v6  ;;  %682 = vmatprep.subr.bf16.mxu1 %v1239_v19  ;;  %v1215_v33 = vld [vmem:[#allocation4 + $0x1a4] ss:$8 sps:$4 sm:$0xff]   ;;  %v1217_v34 = vld [vmem:[#allocation4 + $0x1a0] ss:$8 sps:$4 sm:$0xff]   ;;  %v1259_v35 = vld [vmem:[#allocation4 + $0x50] ss:$8 sps:$4 sm:$0xff]  }
  0x42   :  { %751 = vmatprep.mubr.bf16.mxu0 %v70_v22  ;;  %v1263_v36 = vld [vmem:[#allocation4 + $0x64] ss:$8 sps:$4 sm:$0xff]   ;;  %v1218_v37 = vld [vmem:[#allocation4 + $0x1b4] ss:$8 sps:$4 sm:$0xff]   ;;  %v1220_v38 = vld [vmem:[#allocation4 + $0x1b0] ss:$8 sps:$4 sm:$0xff]  }
  0x43   :  { %v1265_v39 = vld [vmem:[#allocation4 + $0x60] ss:$8 sps:$4 sm:$0xff]   ;;  %v1269_v40 = vld [vmem:[#allocation4 + $0x74] ss:$8 sps:$4 sm:$0xff]   ;;  %v1221_v41 = vld [vmem:[#allocation4 + $0x1c4] ss:$8 sps:$4 sm:$0xff]  }
  0x44   :  { %726 = vmatpush1.bf16.msra.mxu0 %v1196_v7  ;;  %683 = vmatpush1.bf16.msra.mxu1 %v1241_v21  ;;  %v1223_v42 = vld [vmem:[#allocation4 + $0x1c0] ss:$8 sps:$4 sm:$0xff]   ;;  %v1271_v43 = vld [vmem:[#allocation4 + $0x70] ss:$8 sps:$4 sm:$0xff]   ;;  %v1275_v44 = vld [vmem:[#allocation4 + $0x84] ss:$8 sps:$4 sm:$0xff]  }
  0x45   :  { %727 = vmatprep.subr.bf16.mxu0 %v1197_v8  ;;  %684 = vmatprep.subr.bf16.mxu1 %v1245_v25  ;;  %v1224_v45 = vld [vmem:[#allocation4 + $0x1d4] ss:$8 sps:$4 sm:$0xff]   ;;  %v1226_v46 = vld [vmem:[#allocation4 + $0x1d0] ss:$8 sps:$4 sm:$0xff]   ;;  %v1277_v47 = vld [vmem:[#allocation4 + $0x80] ss:$8 sps:$4 sm:$0xff]  }
  0x46   :  { %v1281_v48 = vld [vmem:[#allocation4 + $0x94] ss:$8 sps:$4 sm:$0xff]   ;;  %v1230_v49 = vld [vmem:[#allocation4 + $0x1e4] ss:$8 sps:$4 sm:$0xff]   ;;  %v1232_v50 = vld [vmem:[#allocation4 + $0x1e0] ss:$8 sps:$4 sm:$0xff]  }
  0x47   :  { %v1283_v51 = vld [vmem:[#allocation4 + $0x90] ss:$8 sps:$4 sm:$0xff]   ;;  %v1287_v52 = vld [vmem:[#allocation4 + $0xa4] ss:$8 sps:$4 sm:$0xff]   ;;  %v1236_v53 = vld [vmem:[#allocation4 + $0x1f4] ss:$8 sps:$4 sm:$0xff]  }
  0x48   :  { %728 = vmatpush1.bf16.msra.mxu0 %v1199_v9  ;;  %685 = vmatpush1.bf16.msra.mxu1 %v1247_v27  ;;  %v1238_v54 = vld [vmem:[#allocation4 + $0x1f0] ss:$8 sps:$4 sm:$0xff]   ;;  %v1289_v56 = vld [vmem:[#allocation4 + $0xa0] ss:$8 sps:$4 sm:$0xff]   ;;  %v1293_v57 = vld [vmem:[#allocation4 + $0xb4] ss:$8 sps:$4 sm:$0xff]  }
  0x49   :  { %729 = vmatprep.subr.bf16.mxu0 %v1200_v10  ;;  %686 = vmatprep.subr.bf16.mxu1 %v1251_v28  ;;  %v62_v55 = vld [vmem:[#allocation2 + $0x10] sm:$0xff]  ;;  %v1244_v58 = vld [vmem:[#allocation4 + $0x204] ss:$8 sps:$4 sm:$0xff]   ;;  %v61_v61 = vld [vmem:[#allocation2 + $0x8] sm:$0xff] }
  0x4a   :  { %v69_v59 = vpack.c.bf16 %v62_v55, %v62_v55  ;;  %v1295_v60 = vld [vmem:[#allocation4 + $0xb0] ss:$8 sps:$4 sm:$0xff]   ;;  %v1242_v62 = vld [vmem:[#allocation4 + $0x200] ss:$8 sps:$4 sm:$0xff]   ;;  %v1299_v63 = vld [vmem:[#allocation4 + $0xc4] ss:$8 sps:$4 sm:$0xff]   ;;  %v68_v0 = vpack.c.bf16 %v61_v61, %v61_v61 }
  0x4b   :  { %v1250_v1 = vld [vmem:[#allocation4 + $0x214] ss:$8 sps:$4 sm:$0xff]   ;;  %v1301_v2 = vld [vmem:[#allocation4 + $0xc0] ss:$8 sps:$4 sm:$0xff]   ;;  %v1248_v4 = vld [vmem:[#allocation4 + $0x210] ss:$8 sps:$4 sm:$0xff]  }
  0x4c   :  { %730 = vmatpush1.bf16.msra.mxu0 %v1202_v11  ;;  %687 = vmatpush1.bf16.msra.mxu1 %v1253_v31  ;;  %v65_v3 = vld [vmem:[#allocation2 + $0x28] sm:$0xff]  ;;  %v1256_v7 = vld [vmem:[#allocation4 + $0x224] ss:$8 sps:$4 sm:$0xff]   ;;  %v1254_v8 = vld [vmem:[#allocation4 + $0x220] ss:$8 sps:$4 sm:$0xff]  }
  0x4d   :  { %731 = vmatprep.subr.bf16.mxu0 %v1203_v14  ;;  %688 = vmatprep.subr.bf16.mxu1 %v1257_v32  ;;  %v1305_v5 = vld [vmem:[#allocation4 + $0xd4] ss:$8 sps:$4 sm:$0xff]   ;;  %v72_v6 = vpack.c.bf16 %v65_v3, %v65_v3  ;;  %v1307_v9 = vld [vmem:[#allocation4 + $0xd0] ss:$8 sps:$4 sm:$0xff]   ;;  %v1311_v10 = vld [vmem:[#allocation4 + $0xe4] ss:$8 sps:$4 sm:$0xff]  }
  0x4e   :  { %710 = vmatprep.mubr.bf16.mxu1 %v68_v0  ;;  %v1262_v11 = vld [vmem:[#allocation4 + $0x234] ss:$8 sps:$4 sm:$0xff]   ;;  %v1260_v12 = vld [vmem:[#allocation4 + $0x230] ss:$8 sps:$4 sm:$0xff]   ;;  %v1313_v13 = vld [vmem:[#allocation4 + $0xe0] ss:$8 sps:$4 sm:$0xff]  }
  0x4f   :  { %v1317_v14 = vld [vmem:[#allocation4 + $0xf4] ss:$8 sps:$4 sm:$0xff]   ;;  %v1268_v15 = vld [vmem:[#allocation4 + $0x244] ss:$8 sps:$4 sm:$0xff]   ;;  %v1319_v16 = vld [vmem:[#allocation4 + $0xf0] ss:$8 sps:$4 sm:$0xff]  }
  0x50   :  { %732 = vmatpush1.bf16.msra.mxu0 %v1205_v17  ;;  %689 = vmatpush1.bf16.msra.mxu1 %v1259_v35  ;;  %v60_v17 = vld [vmem:[#allocation2] sm:$0xff]  ;;  %v1274_v20 = vld [vmem:[#allocation4 + $0x254] ss:$8 sps:$4 sm:$0xff]   ;;  %v1284_v32 = vld [vmem:[#allocation4 + $0x270] ss:$8 sps:$4 sm:$0xff]  }
  0x51   :  { %733 = vmatprep.subr.bf16.mxu0 %v1206_v18  ;;  %690 = vmatprep.subr.bf16.mxu1 %v1263_v36  ;;  %v1266_v18 = vld [vmem:[#allocation4 + $0x240] ss:$8 sps:$4 sm:$0xff]   ;;  %v1328_v19 = vld [vmem:[#allocation4 + $0x304] ss:$8 sps:$4 sm:$0xff]   ;;  %v67_v21 = vpack.c.bf16 %v60_v17, %v60_v17  ;;  %v66_v27 = vld [vmem:[#allocation2 + $0x30] sm:$0xff] }
  0x52   :  { %v1326_v22 = vld [vmem:[#allocation4 + $0x300] ss:$8 sps:$4 sm:$0xff]   ;;  %v1280_v25 = vld [vmem:[#allocation4 + $0x264] ss:$8 sps:$4 sm:$0xff]   ;;  %v1333_v31 = vld [vmem:[#allocation6] sm:$0xff]  }
  0x53   :  { %v1278_v28 = vld [vmem:[#allocation4 + $0x260] ss:$8 sps:$4 sm:$0xff]   ;;  %v1335_v35 = vld [vmem:[#allocation6 + $0x8] sm:$0xff]  }
  0x54   :  { %734 = vmatpush1.bf16.msra.mxu0 %v1208_v23  ;;  %691 = vmatpush1.bf16.msra.mxu1 %v1265_v39  ;;  %v1272_v23 = vld [vmem:[#allocation4 + $0x250] ss:$8 sps:$4 sm:$0xff]   ;;  %v1290_v36 = vld [vmem:[#allocation4 + $0x280] ss:$8 sps:$4 sm:$0xff]  }
  0x55   :  { %735 = vmatprep.subr.bf16.mxu0 %v1209_v24  ;;  %692 = vmatprep.subr.bf16.mxu1 %v1269_v40  ;;  %v1332_v24 = vld [vmem:[#allocation6 + $0x40] sm:$0xff]   ;;  %v1337_v39 = vld [vmem:[#allocation6 + $0x10] sm:$0xff]   ;;  %v1338_v55 = vld [vmem:[#allocation6 + $0x58] sm:$0xff]  }
  0x56   :  { %v1296_v40 = vld [vmem:[#allocation4 + $0x290] ss:$8 sps:$4 sm:$0xff]   ;;  %v1344_v61 = vld [vmem:[#allocation6 + $0x70] sm:$0xff]   ;;  %v1347_v0 = vld [vmem:[#allocation6 + $0x38] sm:$0xff]  }
  0x58   :  { %736 = vmatpush1.bf16.msra.mxu0 %v1211_v26  ;;  %693 = vmatpush1.bf16.msra.mxu1 %v1271_v43  ;;  %v1425_v26 = vmov 0   ;;  %v1310_v43 = vld [vmem:[#allocation4 + $0x2b4] ss:$8 sps:$4 sm:$0xff]  }
  0x59   :  { %737 = vmatprep.subr.bf16.mxu0 %v1212_v29  ;;  %694 = vmatprep.subr.bf16.mxu1 %v1275_v44  ;;  %v1286_v29 = vld [vmem:[#allocation4 + $0x274] ss:$8 sps:$4 sm:$0xff]   ;;  %v1308_v44 = vld [vmem:[#allocation4 + $0x2b0] ss:$8 sps:$4 sm:$0xff]  }
  0x5c   :  { %738 = vmatpush1.bf16.msra.mxu0 %v1214_v30  ;;  %695 = vmatpush1.bf16.msra.mxu1 %v1277_v47  ;;  %v73_v30 = vpack.c.bf16 %v66_v27, %v66_v27  ;;  %v1322_v47 = vld [vmem:[#allocation4 + $0x2d4] ss:$8 sps:$4 sm:$0xff]  }
  0x5d   :  { %739 = vmatprep.subr.bf16.mxu0 %v1215_v33  ;;  %696 = vmatprep.subr.bf16.mxu1 %v1281_v48  ;;  %v1334_v33 = vld [vmem:[#allocation6 + $0x48] sm:$0xff]  }
  0x5e   :  { %v1320_v48 = vld [vmem:[#allocation4 + $0x2d0] ss:$8 sps:$4 sm:$0xff]  }
  0x60   :  { %740 = vmatpush1.bf16.msra.mxu0 %v1217_v34  ;;  %697 = vmatpush1.bf16.msra.mxu1 %v1283_v51  ;;  %v1292_v34 = vld [vmem:[#allocation4 + $0x284] ss:$8 sps:$4 sm:$0xff]   ;;  %v1331_v51 = vld [vmem:[#allocation4 + $0x2f4] ss:$8 sps:$4 sm:$0xff]  }
  0x61   :  { %741 = vmatprep.subr.bf16.mxu0 %v1218_v37  ;;  %698 = vmatprep.subr.bf16.mxu1 %v1287_v52  ;;  %v1336_v37 = vld [vmem:[#allocation6 + $0x50] sm:$0xff]   ;;  %v1329_v52 = vld [vmem:[#allocation4 + $0x2f0] ss:$8 sps:$4 sm:$0xff]  }
  0x64   :  { %742 = vmatpush1.bf16.msra.mxu0 %v1220_v38  ;;  %699 = vmatpush1.bf16.msra.mxu1 %v1289_v56  ;;  %v1298_v38 = vld [vmem:[#allocation4 + $0x294] ss:$8 sps:$4 sm:$0xff]   ;;  %v1339_v56 = vld [vmem:[#allocation6 + $0x18] sm:$0xff]  }
  0x65   :  { %743 = vmatprep.subr.bf16.mxu0 %v1221_v41  ;;  %700 = vmatprep.subr.bf16.mxu1 %v1293_v57  ;;  %v1304_v41 = vld [vmem:[#allocation4 + $0x2a4] ss:$8 sps:$4 sm:$0xff]   ;;  %v1340_v57 = vld [vmem:[#allocation6 + $0x60] sm:$0xff]  }
  0x68   :  { %744 = vmatpush1.bf16.msra.mxu0 %v1223_v42  ;;  %701 = vmatpush1.bf16.msra.mxu1 %v1295_v60  ;;  %v1302_v42 = vld [vmem:[#allocation4 + $0x2a0] ss:$8 sps:$4 sm:$0xff]   ;;  %v1343_v60 = vld [vmem:[#allocation6 + $0x28] sm:$0xff]  }
  0x69   :  { %745 = vmatprep.subr.bf16.mxu0 %v1224_v45  ;;  %702 = vmatprep.subr.bf16.mxu1 %v1299_v63  ;;  %v1316_v45 = vld [vmem:[#allocation4 + $0x2c4] ss:$8 sps:$4 sm:$0xff]  }
  0x6a   :  { %v1346_v63 = vld [vmem:[#allocation6 + $0x78] sm:$0xff]  }
  0x6c   :  { %746 = vmatpush1.bf16.msra.mxu0 %v1226_v46  ;;  %703 = vmatpush1.bf16.msra.mxu1 %v1301_v2  ;;  %v1314_v46 = vld [vmem:[#allocation4 + $0x2c0] ss:$8 sps:$4 sm:$0xff]  }
  0x6d   :  { %747 = vmatprep.subr.bf16.mxu0 %v1230_v49  ;;  %704 = vmatprep.subr.bf16.mxu1 %v1305_v5  ;;  %v1325_v49 = vld [vmem:[#allocation4 + $0x2e4] ss:$8 sps:$4 sm:$0xff]  }
  0x70   :  { %748 = vmatpush1.bf16.msra.mxu0 %v1232_v50  ;;  %705 = vmatpush1.bf16.msra.mxu1 %v1307_v9  ;;  %v1323_v50 = vld [vmem:[#allocation4 + $0x2e0] ss:$8 sps:$4 sm:$0xff]   ;;  %v174_v9 = vlaneseq }
  0x71   :  { %749 = vmatprep.subr.bf16.mxu0 %v1236_v53  ;;  %706 = vmatprep.subr.bf16.mxu1 %v1311_v10  ;;  %v64_v53 = vld [vmem:[#allocation2 + $0x20] sm:$0xff] }
  0x72   :  { %v175_v10 = vshrl.u32 %v174_v9, 7 }
  0x74   :  { %750 = vmatpush1.bf16.msra.mxu0 %v1238_v54  ;;  %707 = vmatpush1.bf16.msra.mxu1 %v1313_v13  ;;  %v71_v54 = vpack.c.bf16 %v64_v53, %v64_v53  ;;  %v180_v13 = vsub.s32 1, %v175_v10 }
  0x75   :  { %760 = vmatprep.subr.bf16.mxu0 %v1244_v58  ;;  %708 = vmatprep.subr.bf16.mxu1 %v1317_v14  ;;  %v1341_v58 = vld [vmem:[#allocation6 + $0x20] sm:$0xff]  }
  0x77   :  { %752 = vmatmul.mubr.bf16.vlgmr.msra.gmra.mrb[0].mxu0 %v69_v59  ;;  %v1342_v59 = vld [vmem:[#allocation6 + $0x68] sm:$0xff]  }
  0x78   :  { %761 = vmatpush1.bf16.msra.mxu0 %v1242_v62  ;;  %792 = vmatprep.mubr.bf16.mxu0 %v72_v6  ;;  %v1345_v62 = vld [vmem:[#allocation6 + $0x30] sm:$0xff]  }
  0x79   :  { %762 = vmatprep.subr.bf16.mxu0 %v1250_v1  ;;  %709 = vmatpush1.bf16.msra.mxu1 %v1319_v16 }
  0x7a   :  { %801 = vmatprep.subr.bf16.mxu1 %v1328_v19 }
  0x7c   :  { %763 = vmatpush1.bf16.msra.mxu0 %v1248_v4  ;;  %711 = vmatmul.mubr.bf16.vlgmr.msra.gmra.mrb[0].mxu1 %v67_v21 }
  0x7d   :  { %764 = vmatprep.subr.bf16.mxu0 %v1256_v7  ;;  %802 = vmatpush1.bf16.msra.mxu1 %v1326_v22 }
  0x7e   :  { %833 = vmatprep.mubr.bf16.mxu1 %v1425_v26  ;;  %1145 = vmatprep.subr.bf16.mxu1 %v1332_v24 }
  0x80   :  { %765 = vmatpush1.bf16.msra.mxu0 %v1254_v8 }
  0x81   :  { %766 = vmatprep.subr.bf16.mxu0 %v1262_v11  ;;  %v176_v11 = vsub.s32 0, %v175_v10 }
  0x84   :  { %767 = vmatpush1.bf16.msra.mxu0 %v1260_v12  ;;  %1127 = vmatmul.mubr.msk.bf16.vlgmr.msra.gmra.mrb[4].mxu1 %vm674_vm0, %v73_v30  ;;  %v172_v12 = vld [vmem:[%s1503_s2] sm:$0x3] }
  0x85   :  { %768 = vmatprep.subr.bf16.mxu0 %v1268_v15  ;;  %1146 = vmatpush3.bf16.msra.mxu1 %v1333_v31  ;;  %v177_v14 = vrot.slane %v172_v12, %v176_v11  ;;  %v181_v15 = vrot.slane %v172_v12, %v180_v13  ;;  %v1128_v31 = vld [vmem:[%s1505_s4] ss:$0 sm:$0xff] }
  0x86   :  { %1147 = vmatprep.subr.bf16.mxu1 %v1334_v33 }
  0x88   :  { %769 = vmatpush1.bf16.msra.mxu0 %v1266_v18 }
  0x89   :  { %770 = vmatprep.subr.bf16.mxu0 %v1274_v20  ;;  %1148 = vmatpush3.bf16.msra.mxu1 %v1335_v35 }
  0x8a   :  { %1149 = vmatprep.subr.bf16.mxu1 %v1336_v37 }
  0x8c   :  { %771 = vmatpush1.bf16.msra.mxu0 %v1272_v23 }
  0x8d   :  { %772 = vmatprep.subr.bf16.mxu0 %v1280_v25  ;;  %1150 = vmatpush3.bf16.msra.mxu1 %v1337_v39 }
  0x8e   :  { %1151 = vmatprep.subr.bf16.mxu1 %v1338_v55 }
  0x90   :  { %773 = vmatpush1.bf16.msra.mxu0 %v1278_v28 }
  0x91   :  { %774 = vmatprep.subr.bf16.mxu0 %v1286_v29  ;;  %1152 = vmatpush3.bf16.msra.mxu1 %v1339_v56 }
  0x92   :  { %1153 = vmatprep.subr.bf16.mxu1 %v1340_v57 }
  0x94   :  { %775 = vmatpush1.bf16.msra.mxu0 %v1284_v32 }
  0x95   :  { %776 = vmatprep.subr.bf16.mxu0 %v1292_v34  ;;  %1154 = vmatpush3.bf16.msra.mxu1 %v1341_v58 }
  0x96   :  { %1155 = vmatprep.subr.bf16.mxu1 %v1342_v59 }
  0x98   :  { %777 = vmatpush1.bf16.msra.mxu0 %v1290_v36 }
  0x99   :  { %778 = vmatprep.subr.bf16.mxu0 %v1298_v38  ;;  %1156 = vmatpush3.bf16.msra.mxu1 %v1343_v60 }
  0x9a   :  { %1157 = vmatprep.subr.bf16.mxu1 %v1344_v61 }
  0x9c   :  { %779 = vmatpush1.bf16.msra.mxu0 %v1296_v40 }
  0x9d   :  { %780 = vmatprep.subr.bf16.mxu0 %v1304_v41  ;;  %1158 = vmatpush3.bf16.msra.mxu1 %v1345_v62 }
  0x9e   :  { %1159 = vmatprep.subr.bf16.mxu1 %v1346_v63 }
  0xa0   :  { %781 = vmatpush1.bf16.msra.mxu0 %v1302_v42 }
  0xa1   :  { %782 = vmatprep.subr.bf16.mxu0 %v1310_v43  ;;  %1160 = vmatpush3.bf16.msra.mxu1 %v1347_v0 }
  0xa4   :  { %783 = vmatpush1.bf16.msra.mxu0 %v1308_v44 }
  0xa5   :  { %784 = vmatprep.subr.bf16.mxu0 %v1316_v45 }
  0xa8   :  { %785 = vmatpush1.bf16.msra.mxu0 %v1314_v46 }
  0xa9   :  { %786 = vmatprep.subr.bf16.mxu0 %v1322_v47 }
  0xac   :  { %787 = vmatpush1.bf16.msra.mxu0 %v1320_v48 }
  0xad   :  { %788 = vmatprep.subr.bf16.mxu0 %v1325_v49 }
  0xb0   :  { %789 = vmatpush1.bf16.msra.mxu0 %v1323_v50 }
  0xb1   :  { %790 = vmatprep.subr.bf16.mxu0 %v1331_v51 }
  0xb4   :  { %791 = vmatpush1.bf16.msra.mxu0 %v1329_v52 }
  0xb7   :  { %793 = vmatmul.mubr.bf16.vlgmr.msra.gmra.mrb[0].mxu0 %v71_v54 }
 0x14f   :  { %v712_v1 = vpop.f32.mrb[0].mxu1 }
 0x150   :  { %v714_v2 = vpop.f32.mrb[1].mxu1  ;;  %v713_v16 = vadd.f32 %v712_v1, %v177_v14 }
 0x151   :  { %v716_v3 = vpop.f32.mrb[2].mxu1  ;;  %v715_v17 = vadd.f32 %v714_v2, %v181_v15 }
 0x152   :  { %v717_v4 = vpop.f32.mrb[3].mxu1 }
 0x157   :  { %v835_v5 = vpop.f32.mrb[4].mxu1 }
 0x158   :  { %v837_v6 = vpop.f32.mrb[5].mxu1 }
 0x159   :  { %v839_v7 = vpop.f32.mrb[6].mxu1 }
 0x15a   :  { %v840_v8 = vpop.f32.mrb[7].mxu1 }
 0x18a   :  { %v794_v18 = vpop.f32.mrb[0].mxu0 }
 0x18b   :  { %v1168_v19 = vadd.f32 %v794_v18, %v713_v16  ;;  %v796_v20 = vpop.f32.mrb[1].mxu0 }
 0x18c   :  { %v1171_v21 = vadd.f32 %v796_v20, %v715_v17  ;;  %v798_v22 = vpop.f32.mrb[2].mxu0 }
 0x18d   :  { %v1169_v23 = vadd.f32 %v1168_v19, %v835_v5  ;;  %v799_v24 = vpop.f32.mrb[3].mxu0 }
 0x18e   :  { %v1172_v25 = vadd.f32 %v1171_v21, %v837_v6 }
 0x18f   :  { %v842_v26 = vmax.f32 %v1169_v23, 0.0 }
 0x190   :  { %v843_v27 = vmax.f32 %v1172_v25, 0.0 }
 0x191   :  { %v844_v29 = vpack.c.bf16 %v842_v26, %v842_v26 }
 0x192   :  { %v845_v28 = vpack.c.bf16 %v843_v27, %v843_v27 }
 0x194   :  { %1013 = vmatprep.mubr.bf16.mxu1 %v845_v28 }
 0x195   :  { %1014 = vmatmul.mubr.bf16.vlgmr.msra.gmra.mrb[8].mxu1 %v844_v29 }
 0x268   :  { %v1161_v30 = vpop.f32.mrb[8].mxu1 }
 0x269   :  { %v1162_v32 = vpop.f32.mrb[9].mxu1 }
 0x26a   :  { %v1163_v33 = vadd.f32 %v1162_v32, %v1161_v30  ;;  %v1164_v34 = vpop.f32.mrb[10].mxu1 }
 0x26b   :  { %v1165_v35 = vpop.f32.mrb[11].mxu1 }
 0x26c   :  { %v1016_v36 = vadd.f32 %v1163_v33, %v1128_v31 }
 0x26e   :  { %v1021_v37 = vpack.c.bf16 %v1016_v36, %v1016_v36 }
 0x270   :  { %1022 = vst [vmem:[%s1506_s5] sm:$0xf] %v1021_v37 }
 0x271   :  { %1027 = vsyncpa [#allocation3], 1 }
 0x272   :  { %1028 = vsyncpa [#allocation5], 1 }

</bundles_post_ra>
